<compile_context>
chip_gen: v7x
topology: tpu7x:2x2x1
jax: 0.10.0
libtpu: 0.0.40
codegen_flags: <defaults>
</compile_context>

<pallas_src>
import functools
import math

import jax
import jax.numpy as jnp
from jax.experimental import pallas as pl
from jax.experimental.pallas import tpu as pltpu


def winenet_kernel(x_ref, w1_ref, b1_ref, w2_ref, b2_ref, w3_ref, b3_ref,
                   out_ref, *, apply_softmax, n_out):
    # x block arrives in the original (batch, feature) orientation; transpose
    # the tiny (TB, 2) slab in-kernel so the batch dim sits on the 128-lane
    # axis for all subsequent work (XLU transpose co-issues with VPU/EUP/MXU).
    xt = x_ref[...].T                                # (2, TB) f32
    w1 = w1_ref[...]                                 # (H, 2)

    # fc1: K=2 contraction as two VPU rank-1 FMAs (MXU would be ~1.5% utilized).
    h = w1[:, 0:1] * xt[0:1, :] + w1[:, 1:2] * xt[1:2, :] + b1_ref[...]   # (H, TB)
    h = 0.5 * jnp.tanh(0.5 * h) + 0.5                # sigmoid, EUP-only (no f32 divide)

    # fc2 / fc3: MXU matmuls, f32 accumulation, batch stays lane-dense.
    h = jnp.dot(w2_ref[...], h, preferred_element_type=jnp.float32) + b2_ref[...]
    h = 0.5 * jnp.tanh(0.5 * h) + 0.5
    logits = jnp.dot(w3_ref[...], h, preferred_element_type=jnp.float32) + b3_ref[...]

    if apply_softmax:
        # 3-row class reduction via explicit slices: stays on VPU (no XLU reduce).
        m = logits[0:1, :]
        for r in range(1, n_out):
            m = jnp.maximum(m, logits[r:r + 1, :])
        e = jnp.exp(logits - m)                      # EUP
        denom = e[0:1, :]
        for r in range(1, n_out):
            denom = denom + e[r:r + 1, :]
        logits = e * pl.reciprocal(denom, approx=True)

    out_ref[...] = logits.astype(out_ref.dtype)


def _max_tile_for_vmem(H, n_out, budget_bytes=24 * 1024 * 1024):
    """Largest lane-dense batch tile whose per-step VMEM footprint fits the budget."""
    per_col_bytes = 4 * (
        2 * 128      # double-buffered (tile, 2) x block, lane-padded to 128
        + 2 * 8      # double-buffered (n_out, tile) out block, sublane-padded to 8
        + 8          # in-kernel (2, tile) transposed x
        + 2 * H      # h1 / h2 f32 intermediates
        + 2 * 8      # logits + softmax temporaries
    )
    t = budget_bytes // per_col_bytes
    return max(128, (t // 128) * 128)


def _choose_tile_b(B, requested, H, n_out):
    cap = min(32768, _max_tile_for_vmem(H, n_out))   # v7x-safe VMEM cap
    tile = max(128, min((requested // 128) * 128, cap))
    if B < 256:
        tile = 128
    elif B <= tile:
        # Whole batch would fit in one tile: shrink so the grid keeps >=2 steps
        # (v7x megacore split + DMA/compute overlap).
        tile = max(128, (((B + 1) // 2) // 128) * 128)
    return tile


def winenet_forward(x, params, *, apply_softmax=False, tile_b=8192):
    """Forward pass (logits by default; probabilities if apply_softmax=True).

    x: (B, 2) float32. Weights are PyTorch layout (out_features, in_features),
    biases are (out_features, 1).
    """
    w1, b1, w2, b2, w3, b3 = params
    B = x.shape[0]
    H = w1.shape[0]
    n_out = w3.shape[0]

    tile_b = _choose_tile_b(B, tile_b, H, n_out)
    Bp = pl.cdiv(B, tile_b) * tile_b

    xp = x.astype(jnp.float32)
    if Bp != B:
        # Zero-pad only when B is not a tile multiple (padded columns are
        # finite through sigmoid/softmax and sliced off below).
        xp = jnp.pad(xp, ((0, Bp - B), (0, 0)))

    grid = (Bp // tile_b,)

    n_weight_elems = H * 2 + H + H * H + H + n_out * H + n_out
    cost = pl.CostEstimate(
        flops=int(2 * Bp * (2 * H + H * H + H * n_out)),
        transcendentals=int(Bp * (2 * H + (n_out if apply_softmax else 0))),
        bytes_accessed=int(4 * (2 * Bp + n_out * Bp + n_weight_elems)),
    )

    kernel = functools.partial(winenet_kernel, apply_softmax=apply_softmax,
                               n_out=n_out)

    outT = pl.pallas_call(
        kernel,
        out_shape=jax.ShapeDtypeStruct((n_out, Bp), jnp.float32),
        grid=grid,
        in_specs=[
            # x tile in original (batch, 2) orientation, indexed by the grid.
            pl.BlockSpec((tile_b, 2), lambda i: (i, 0)),
            # Weights / biases: constant index_map -> VMEM-resident across steps.
            # (At H=32 double-buffering them is negligible; for very large H
            #  move them to pl.ANY + a one-time manual copy instead.)
            pl.BlockSpec((H, 2), lambda i: (0, 0)),
            pl.BlockSpec((H, 1), lambda i: (0, 0)),
            pl.BlockSpec((H, H), lambda i: (0, 0)),
            pl.BlockSpec((H, 1), lambda i: (0, 0)),
            pl.BlockSpec((n_out, H), lambda i: (0, 0)),
            pl.BlockSpec((n_out, 1), lambda i: (0, 0)),
        ],
        # Lane-dense output: batch on the 128-lane axis -> unmasked vst.
        out_specs=pl.BlockSpec((n_out, tile_b), lambda i: (0, i)),
        compiler_params=pltpu.CompilerParams(
            dimension_semantics=("parallel",),      # batch axis across TCs on v7x
            vmem_limit_bytes=32 * 1024 * 1024,      # tile cap keeps usage < ~24 MiB
        ),
        cost_estimate=cost,
    )(xp, w1, b1, w2, b2, w3, b3)

    # PyTorch convention is (B, n_out).
    # TODO(synk): callers that can consume the lane-dense (3, B) result directly
    # should take `outT[:, :B]` and skip this extra XLA transpose pass.
    return outT[:, :B].T


def winenet_inference(x, params, *, tile_b=8192):
    """WineNet.inference = forward + softmax(dim=1), fused inside the kernel."""
    return winenet_forward(x, params, apply_softmax=True, tile_b=tile_b)


def init_params(key, n_hidden_neurons):
    """Deterministic init mimicking torch.nn.Linear (uniform +-1/sqrt(fan_in)).
    Weights in PyTorch layout (out_features, in_features); biases (out_features, 1)."""
    def linear(key, fan_in, fan_out):
        kw, kb = jax.random.split(key)
        bound = 1.0 / math.sqrt(float(fan_in))
        w = jax.random.uniform(kw, (fan_out, fan_in), jnp.float32, -bound, bound)
        b = jax.random.uniform(kb, (fan_out, 1), jnp.float32, -bound, bound)
        return w, b

    k1, k2, k3 = jax.random.split(key, 3)
    w1, b1 = linear(k1, 2, n_hidden_neurons)
    w2, b2 = linear(k2, n_hidden_neurons, n_hidden_neurons)
    w3, b3 = linear(k3, n_hidden_neurons, 3)
    return (w1, b1, w2, b2, w3, b3)


def reference_forward(x, params):
    w1, b1, w2, b2, w3, b3 = params
    h1 = jax.nn.sigmoid(x @ w1.T + b1[:, 0])
    h2 = jax.nn.sigmoid(h1 @ w2.T + b2[:, 0])
    return h2 @ w3.T + b3[:, 0]


if __name__ == "__main__":
    key = jax.random.PRNGKey(0)
    k_params, k_x1, k_x2 = jax.random.split(key, 3)

    n_hidden = 32
    params = init_params(k_params, n_hidden)

    # Small batch (toy use-case; padded to one lane-dense tile).
    x_small = jax.random.normal(k_x1, (8, 2), jnp.float32)
    logits = winenet_forward(x_small, params)
    jax.block_until_ready(logits)
    ref = reference_forward(x_small, params)
    assert logits.shape == (8, 3)
    assert jnp.allclose(logits, ref, atol=1e-4, rtol=1e-4), "forward mismatch (small batch)"

    probs = winenet_inference(x_small, params)
    jax.block_until_ready(probs)
    assert jnp.allclose(jnp.sum(probs, axis=1), 1.0, atol=2e-3), "softmax rows don't sum to 1"
    assert jnp.allclose(probs, jax.nn.softmax(ref, axis=1), atol=2e-3), "inference mismatch"

    # Larger, non-tile-multiple batch: exercises padding + multi-step parallel grid.
    x_big = jax.random.normal(k_x2, (1000, 2), jnp.float32)
    logits_big = winenet_forward(x_big, params)
    jax.block_until_ready(logits_big)
    ref_big = reference_forward(x_big, params)
    assert logits_big.shape == (1000, 3)
    assert jnp.allclose(logits_big, ref_big, atol=1e-4, rtol=1e-4), "forward mismatch (big batch)"

    print("KERNEL_OK")
</pallas_src>

<mosaic_0001>
module attributes {stable_mosaic.version = 11 : i64} {
  func.func @winenet_kernel(%arg0: i32, %arg1: memref<128x2xf32, #tpu.memory_space<vmem>>, %arg2: memref<32x2xf32, #tpu.memory_space<vmem>>, %arg3: memref<32x1xf32, #tpu.memory_space<vmem>>, %arg4: memref<32x32xf32, #tpu.memory_space<vmem>>, %arg5: memref<32x1xf32, #tpu.memory_space<vmem>>, %arg6: memref<3x32xf32, #tpu.memory_space<vmem>>, %arg7: memref<3x1xf32, #tpu.memory_space<vmem>>, %arg8: memref<3x128xf32, #tpu.memory_space<vmem>>) attributes {dimension_semantics = [#tpu.dimension_semantics<parallel>], iteration_bounds = array<i64: 1>, scalar_prefetch = 0 : i64, scratch_operands = 0 : i64, tpu.core_type = #tpu.core_type<tc>, window_params = [{transform_indices = @transform_0, window_bounds = array<i64: 128, 2>}, {pipeline_mode = #tpu.pipeline_mode<synchronous>, transform_indices = @transform_1, window_bounds = array<i64: 32, 2>}, {pipeline_mode = #tpu.pipeline_mode<synchronous>, transform_indices = @transform_2, window_bounds = array<i64: 32, 1>}, {pipeline_mode = #tpu.pipeline_mode<synchronous>, transform_indices = @transform_3, window_bounds = array<i64: 32, 32>}, {pipeline_mode = #tpu.pipeline_mode<synchronous>, transform_indices = @transform_4, window_bounds = array<i64: 32, 1>}, {pipeline_mode = #tpu.pipeline_mode<synchronous>, transform_indices = @transform_5, window_bounds = array<i64: 3, 32>}, {pipeline_mode = #tpu.pipeline_mode<synchronous>, transform_indices = @transform_6, window_bounds = array<i64: 3, 1>}, {transform_indices = @transform_7, window_bounds = array<i64: 3, 128>}]} {
    %c0 = arith.constant 0 : index
    %c0_0 = arith.constant 0 : index
    %0 = vector.load %arg1[%c0, %c0_0] : memref<128x2xf32, #tpu.memory_space<vmem>>, vector<128x2xf32>
    %1 = tpu.transpose %0, [1, 0] : vector<128x2xf32> -> vector<2x128xf32>
    %c0_1 = arith.constant 0 : index
    %c0_2 = arith.constant 0 : index
    %2 = vector.load %arg2[%c0_1, %c0_2] : memref<32x2xf32, #tpu.memory_space<vmem>>, vector<32x2xf32>
    %3 = vector.extract_strided_slice %2 {offsets = [0, 0], sizes = [32, 1], strides = [1, 1]} : vector<32x2xf32> to vector<32x1xf32>
    %4 = vector.extract_strided_slice %1 {offsets = [0, 0], sizes = [1, 128], strides = [1, 1]} : vector<2x128xf32> to vector<1x128xf32>
    %5 = vector.broadcast %3 : vector<32x1xf32> to vector<32x128xf32>
    %6 = vector.broadcast %4 : vector<1x128xf32> to vector<32x128xf32>
    %7 = arith.mulf %5, %6 : vector<32x128xf32>
    %8 = vector.extract_strided_slice %2 {offsets = [0, 1], sizes = [32, 1], strides = [1, 1]} : vector<32x2xf32> to vector<32x1xf32>
    %9 = vector.extract_strided_slice %1 {offsets = [1, 0], sizes = [1, 128], strides = [1, 1]} : vector<2x128xf32> to vector<1x128xf32>
    %10 = vector.broadcast %8 : vector<32x1xf32> to vector<32x128xf32>
    %11 = vector.broadcast %9 : vector<1x128xf32> to vector<32x128xf32>
    %12 = arith.mulf %10, %11 : vector<32x128xf32>
    %13 = arith.addf %7, %12 : vector<32x128xf32>
    %c0_3 = arith.constant 0 : index
    %c0_4 = arith.constant 0 : index
    %14 = vector.load %arg3[%c0_3, %c0_4] : memref<32x1xf32, #tpu.memory_space<vmem>>, vector<32x1xf32>
    %15 = vector.broadcast %14 : vector<32x1xf32> to vector<32x128xf32>
    %16 = arith.addf %13, %15 : vector<32x128xf32>
    %cst = arith.constant 5.000000e-01 : f32
    %17 = vector.broadcast %cst : f32 to vector<32x128xf32>
    %18 = arith.mulf %17, %16 : vector<32x128xf32>
    %19 = math.tanh %18 : vector<32x128xf32>
    %cst_5 = arith.constant 5.000000e-01 : f32
    %20 = vector.broadcast %cst_5 : f32 to vector<32x128xf32>
    %21 = arith.mulf %20, %19 : vector<32x128xf32>
    %cst_6 = arith.constant 5.000000e-01 : f32
    %22 = vector.broadcast %cst_6 : f32 to vector<32x128xf32>
    %23 = arith.addf %21, %22 : vector<32x128xf32>
    %c0_7 = arith.constant 0 : index
    %c0_8 = arith.constant 0 : index
    %24 = vector.load %arg4[%c0_7, %c0_8] : memref<32x32xf32, #tpu.memory_space<vmem>>, vector<32x32xf32>
    %cst_9 = arith.constant dense<0.000000e+00> : vector<32x128xf32>
    %25 = tpu.matmul %24, %23, %cst_9 {dimension_numbers = #tpu.dot_dimension_numbers<[1], [0], [0], [1], [0, 0, 1, 1], [], []>} : vector<32x32xf32>, vector<32x128xf32>, vector<32x128xf32> -> vector<32x128xf32>
    %c0_10 = arith.constant 0 : index
    %c0_11 = arith.constant 0 : index
    %26 = vector.load %arg5[%c0_10, %c0_11] : memref<32x1xf32, #tpu.memory_space<vmem>>, vector<32x1xf32>
    %27 = vector.broadcast %26 : vector<32x1xf32> to vector<32x128xf32>
    %28 = arith.addf %25, %27 : vector<32x128xf32>
    %cst_12 = arith.constant 5.000000e-01 : f32
    %29 = vector.broadcast %cst_12 : f32 to vector<32x128xf32>
    %30 = arith.mulf %29, %28 : vector<32x128xf32>
    %31 = math.tanh %30 : vector<32x128xf32>
    %cst_13 = arith.constant 5.000000e-01 : f32
    %32 = vector.broadcast %cst_13 : f32 to vector<32x128xf32>
    %33 = arith.mulf %32, %31 : vector<32x128xf32>
    %cst_14 = arith.constant 5.000000e-01 : f32
    %34 = vector.broadcast %cst_14 : f32 to vector<32x128xf32>
    %35 = arith.addf %33, %34 : vector<32x128xf32>
    %c0_15 = arith.constant 0 : index
    %c0_16 = arith.constant 0 : index
    %36 = vector.load %arg6[%c0_15, %c0_16] : memref<3x32xf32, #tpu.memory_space<vmem>>, vector<3x32xf32>
    %cst_17 = arith.constant dense<0.000000e+00> : vector<3x128xf32>
    %37 = tpu.matmul %36, %35, %cst_17 {dimension_numbers = #tpu.dot_dimension_numbers<[1], [0], [0], [1], [0, 0, 1, 1], [], []>} : vector<3x32xf32>, vector<32x128xf32>, vector<3x128xf32> -> vector<3x128xf32>
    %c0_18 = arith.constant 0 : index
    %c0_19 = arith.constant 0 : index
    %38 = vector.load %arg7[%c0_18, %c0_19] : memref<3x1xf32, #tpu.memory_space<vmem>>, vector<3x1xf32>
    %39 = vector.broadcast %38 : vector<3x1xf32> to vector<3x128xf32>
    %40 = arith.addf %37, %39 : vector<3x128xf32>
    %c0_20 = arith.constant 0 : index
    %c0_21 = arith.constant 0 : index
    %41 = vector.load %arg8[%c0_20, %c0_21] : memref<3x128xf32, #tpu.memory_space<vmem>>, vector<3x128xf32>
    tpu.vector_store %arg8[%c0_20, %c0_21], %40 {strides = array<i32>} : memref<3x128xf32, #tpu.memory_space<vmem>>, vector<3x128xf32>,
    return
  }
  func.func @transform_0(%arg0: i32) -> (i32, i32) {
    %c0_i32 = arith.constant 0 : i32
    %c0_i32_0 = arith.constant 0 : i32
    return %arg0, %c0_i32 : i32, i32
  }
  func.func @transform_1(%arg0: i32) -> (i32, i32) {
    %c0_i32 = arith.constant 0 : i32
    %c0_i32_0 = arith.constant 0 : i32
    %c0_i32_1 = arith.constant 0 : i32
    return %c0_i32, %c0_i32_0 : i32, i32
  }
  func.func @transform_2(%arg0: i32) -> (i32, i32) {
    %c0_i32 = arith.constant 0 : i32
    %c0_i32_0 = arith.constant 0 : i32
    %c0_i32_1 = arith.constant 0 : i32
    return %c0_i32, %c0_i32_0 : i32, i32
  }
  func.func @transform_3(%arg0: i32) -> (i32, i32) {
    %c0_i32 = arith.constant 0 : i32
    %c0_i32_0 = arith.constant 0 : i32
    %c0_i32_1 = arith.constant 0 : i32
    return %c0_i32, %c0_i32_0 : i32, i32
  }
  func.func @transform_4(%arg0: i32) -> (i32, i32) {
    %c0_i32 = arith.constant 0 : i32
    %c0_i32_0 = arith.constant 0 : i32
    %c0_i32_1 = arith.constant 0 : i32
    return %c0_i32, %c0_i32_0 : i32, i32
  }
  func.func @transform_5(%arg0: i32) -> (i32, i32) {
    %c0_i32 = arith.constant 0 : i32
    %c0_i32_0 = arith.constant 0 : i32
    %c0_i32_1 = arith.constant 0 : i32
    return %c0_i32, %c0_i32_0 : i32, i32
  }
  func.func @transform_6(%arg0: i32) -> (i32, i32) {
    %c0_i32 = arith.constant 0 : i32
    %c0_i32_0 = arith.constant 0 : i32
    %c0_i32_1 = arith.constant 0 : i32
    return %c0_i32, %c0_i32_0 : i32, i32
  }
  func.func @transform_7(%arg0: i32) -> (i32, i32) {
    %c0_i32 = arith.constant 0 : i32
    %c0_i32_0 = arith.constant 0 : i32
    return %c0_i32, %arg0 : i32, i32
  }
}

</mosaic_0001>

<bundles_post_ra>
// kernel: tpu_custom_call.1
= control target key start
LH: loop header
LB: loop body
LE: loop exit
PB: predicated region body
PF: predicated region fallthrough
CT: control target
= control target key end

     0   :  { %v525_v2 = vmov 1   ;;  %v526_v4 = vmov 0   ;;  %s690_s0 = inlined_call_operand.vmem [shape: f32[128,2], index: 0, kind: input, shape index: {}]   ;;  %s691_s1 = inlined_call_operand.vmem [shape: f32[32,2], index: 1, kind: input, shape index: {}]   ;;  %s692_s2 = inlined_call_operand.vmem [shape: f32[32,1], index: 2, kind: input, shape index: {}]   ;;  %s693_s3 = inlined_call_operand.vmem [shape: f32[32,32], index: 3, kind: input, shape index: {}]   ;;  %s694_s4 = inlined_call_operand.vmem [shape: f32[32,1], index: 4, kind: input, shape index: {}]   ;;  %s695_s5 = inlined_call_operand.vmem [shape: f32[3,32], index: 5, kind: input, shape index: {}]   ;;  %s696_s6 = inlined_call_operand.vmem [shape: f32[3,1], index: 6, kind: input, shape index: {}]   ;;  %s697_s7 = inlined_call_operand.hbm [shape: f32[3,128], index: 7, kind: output, shape index: {}]  }
   0x1   :  { %v77_v0 = vld [vmem:[%s691_s1 + $0x10] sm:$0xff]  ;;  %v75_v1 = vld [vmem:[%s691_s1] sm:$0xff]  ;;  %481 = vset.pattern.permute.xlu0 %v525_v2  ;;  %479 = vset.pattern.permute.xlu1 %v525_v2  ;;  %v76_v3 = vld [vmem:[%s691_s1 + $0x8] sm:$0xff] }
   0x2   :  { %116 = vperm.xlu0 %481, %v77_v0   ;;  %108 = vperm.xlu1 %479, %v75_v1   ;;  %v78_v5 = vld [vmem:[%s691_s1 + $0x18] sm:$0xff] }
   0x6   :  { %482 = vset.pattern.permute.xlu0 %v526_v4  ;;  %112 = vperm.xlu1 %479, %v76_v3  }
   0x7   :  { %81 = vperm.xlu0 %482, %v75_v1  }
   0x8   :  { %12 = vsyncpa [#allocation3], 0  ;;  %v136_v6 = vld [vmem:[%s692_s2 + $0x8] sm:$0xff]  ;;  %v135_v7 = vld [vmem:[%s692_s2] sm:$0xff]  ;;  %vm207_vm0 = vcmask 261120   ;;  %v99_v39 = vlaneseq  ;;  %vm528_vm1 = vmmov 0  }
   0x9   :  { %v137_v8 = vld [vmem:[%s692_s2 + $0x10] sm:$0xff]  ;;  %v138_v9 = vld [vmem:[%s692_s2 + $0x18] sm:$0xff]  ;;  %v183_v10 = vld [vmem:[%s694_s4] sm:$0xff]  ;;  %s530_s13 = smov [#allocation2]  }
   0xa   :  { %480 = vset.pattern.permute.xlu1 %v526_v4  ;;  %v184_v11 = vld [vmem:[%s694_s4 + $0x8] sm:$0xff]  ;;  %v185_v12 = vld [vmem:[%s694_s4 + $0x10] sm:$0xff]  ;;  %v186_v13 = vld [vmem:[%s694_s4 + $0x18] sm:$0xff]  ;;  %v100_v41 = vshrl.u32 %v99_v39, 7  ;;  %s408_s1 = sshll.u32 %s530_s13, 4  ;;  %s409_s1 = int_to_ptr.vmem [resolvable:$true] %s408_s1 }
   0xb   :  { %86 = vperm.xlu0 %482, %v76_v3   ;;  %96 = vperm.xlu1 %480, %v78_v5   ;;  %v27_v14 = vld [vmem:[%s690_s0] sm:$0xff]  ;;  %v28_v16 = vld [vmem:[%s690_s0 + $0x8] sm:$0xff]  ;;  %v29_v17 = vld [vmem:[%s690_s0 + $0x10] sm:$0xff]  ;;  %s501_s14 = scalar_lea.vmem %s409_s1, 64  ;;  %p506_p1 = scmp.lt.s32.totalorder %s409_s1, %s409_s1 }
   0xc   :  { %v322_v15 = vld [vmem:[%s696_s6] sm:$0x7]  ;;  %v30_v18 = vld [vmem:[%s690_s0 + $0x18] sm:$0xff]  ;;  %v32_v20 = vld [vmem:[%s690_s0 + $0x28] sm:$0xff]  ;;  %v101_v44 = vsub.s32 0, %v100_v41  ;;  %v125_v45 = vsub.s32 1, %v100_v41  ;;  %p502_p0 = scmp.ne.s32.totalorder %s409_s1, %s501_s14  ;;  %p507_p2 = scmp.lt.s32.totalorder %s501_s14, %s501_s14 }
   0xd   :  { %v31_v19 = vld [vmem:[%s690_s0 + $0x20] sm:$0xff]  ;;  %v33_v21 = vld [vmem:[%s690_s0 + $0x30] sm:$0xff]  ;;  %v34_v22 = vld [vmem:[%s690_s0 + $0x38] sm:$0xff] }
   0xe   :  { %v35_v23 = vld [vmem:[%s690_s0 + $0x40] sm:$0xff]  ;;  %v36_v24 = vld [vmem:[%s690_s0 + $0x48] sm:$0xff]  ;;  %v37_v26 = vld [vmem:[%s690_s0 + $0x50] sm:$0xff]  ;;  %p508_p3 = por %p507_p2, %p506_p1 }
   0xf   :  { %91 = vperm.xlu0 %482, %v77_v0   ;;  %483 = vset.pattern.permute.xlu1 %v525_v2  ;;  %v179_v25 = vld [vmem:[%s693_s3] sm:$0xff]  ;;  %v38_v27 = vld [vmem:[%s690_s0 + $0x58] sm:$0xff]  ;;  %v40_v29 = vld [vmem:[%s690_s0 + $0x68] sm:$0xff] }
  0x10   :  { %120 = vperm.xlu1 %483, %v78_v5   ;;  %442 = vmatprep.mubr.msk.f32.mxu0 %vm207_vm0, %v179_v25  ;;  %v39_v28 = vld [vmem:[%s690_s0 + $0x60] sm:$0xff]  ;;  %v41_v30 = vld [vmem:[%s690_s0 + $0x70] sm:$0xff]  ;;  %v42_v31 = vld [vmem:[%s690_s0 + $0x78] sm:$0xff]  ;;  %v529_v25 = vmov 0.0   ;;  %p509_p4 = pnand %p508_p3, %p502_p0 }
  0x11   :  { %456 = vmatprep.mubr.msk.f32.mxu1 %vm528_vm1, %v529_v25 }
  0x13   :  { %146 = vperm.xlu0 %482, %v136_v6  }
  0x14   :  { %484 = vset.pattern.permute.xlu1 %v526_v4 }
  0x15   :  { %141 = vperm.xlu1 %484, %v135_v7  }
  0x19   :  { %151 = vperm.xlu1 %484, %v137_v8  }
  0x1d   :  { %156 = vperm.xlu1 %484, %v138_v9  }
  0x21   :  { %189 = vperm.xlu1 %484, %v183_v10  }
  0x25   :  { %194 = vperm.xlu1 %484, %v184_v11  }
  0x29   :  { %199 = vperm.xlu1 %484, %v185_v12  }
  0x2d   :  { %204 = vperm.xlu1 %484, %v186_v13  }
  0x31   :  { %43 = vxpose.xlu0.b32.start [1/16] (narrow) %v27_v14, 8  ;;  %325 = vperm.xlu1 %484, %v322_v15  }
  0x35   :  { %44 = vxpose.xlu0.b32.cont [2/16] (narrow) %v28_v16, 8 }
  0x39   :  { %45 = vxpose.xlu0.b32.cont [3/16] (narrow) %v29_v17, 8 }
  0x3d   :  { %46 = vxpose.xlu0.b32.cont [4/16] (narrow) %v30_v18, 8 }
  0x41   :  { %47 = vxpose.xlu0.b32.cont [5/16] (narrow) %v31_v19, 8 }
  0x45   :  { %48 = vxpose.xlu0.b32.cont [6/16] (narrow) %v32_v20, 8 }
  0x49   :  { %49 = vxpose.xlu0.b32.cont [7/16] (narrow) %v33_v21, 8  ;;  %v180_v21 = vld [vmem:[%s693_s3 + $0x8] sm:$0xff] }
  0x4d   :  { %50 = vxpose.xlu0.b32.cont [8/16] (narrow) %v34_v22, 8  ;;  %v181_v22 = vld [vmem:[%s693_s3 + $0x10] sm:$0xff] }
  0x51   :  { %51 = vxpose.xlu0.b32.cont [9/16] (narrow) %v35_v23, 8  ;;  %v182_v23 = vld [vmem:[%s693_s3 + $0x18] sm:$0xff] }
  0x55   :  { %52 = vxpose.xlu0.b32.cont [10/16] (narrow) %v36_v24, 8  ;;  %v527_v24 = vmov 0.0|0.0  }
  0x56   :  { %467 = vmatprep.subr.bf16.mxu1 %v527_v24 }
  0x59   :  { %53 = vxpose.xlu0.b32.cont [11/16] (narrow) %v37_v26, 8 }
  0x5d   :  { %54 = vxpose.xlu0.b32.cont [12/16] (narrow) %v38_v27, 8 }
  0x61   :  { %55 = vxpose.xlu0.b32.cont [13/16] (narrow) %v39_v28, 8 }
  0x65   :  { %56 = vxpose.xlu0.b32.cont [14/16] (narrow) %v40_v29, 8 }
  0x69   :  { %57 = vxpose.xlu0.b32.cont [15/16] (narrow) %v41_v30, 8 }
  0x6d   :  { %58 = vxpose.xlu0.b32.end [16/16] (narrow) %v42_v31, 8 }
  0x81   :  { %v109_v32 = vpop.permute.xlu1 %108  ;;  %v117_v33 = vpop.permute.xlu0 %116 }
  0x85   :  { %v113_v34 = vpop.permute.xlu1 %112 }
  0x86   :  { %v82_v35 = vpop.permute.xlu0 %81 }
  0x8a   :  { %v97_v36 = vpop.permute.xlu1 %96  ;;  %v87_v37 = vpop.permute.xlu0 %86 }
  0x8e   :  { %v92_v40 = vpop.permute.xlu0 %91 }
  0x8f   :  { %v121_v38 = vpop.permute.xlu1 %120 }
  0x92   :  { %v147_v43 = vpop.permute.xlu0 %146 }
  0x94   :  { %v142_v42 = vpop.permute.xlu1 %141 }
  0x98   :  { %v152_v47 = vpop.permute.xlu1 %151 }
  0x9c   :  { %v157_v62 = vpop.permute.xlu1 %156 }
  0xa0   :  { %v190_v26 = vpop.permute.xlu1 %189 }
  0xa4   :  { %v195_v27 = vpop.permute.xlu1 %194 }
  0xa8   :  { %v200_v28 = vpop.permute.xlu1 %199 }
  0xb1   :  { %v59_v46 = vpop.trf.xlu0 }
  0xb2   :  { %v102_v48 = vrot.slane %v59_v46, %v101_v44  ;;  %v126_v49 = vrot.slane %v59_v46, %v125_v45 }
  0xb4   :  { %v103_v50 = vmul.f32 %v102_v48, %v82_v35  ;;  %v104_v51 = vmul.f32 %v102_v48, %v87_v37  ;;  %v105_v52 = vmul.f32 %v102_v48, %v92_v40  ;;  %v106_v53 = vmul.f32 %v102_v48, %v97_v36 }
  0xb5   :  { %v127_v54 = vmul.f32 %v126_v49, %v109_v32  ;;  %v128_v55 = vmul.f32 %v126_v49, %v113_v34  ;;  %v129_v56 = vmul.f32 %v126_v49, %v117_v33  ;;  %v130_v57 = vmul.f32 %v126_v49, %v121_v38  ;;  %v205_v34 = vpop.permute.xlu1 %204 }
  0xb7   :  { %v133_v58 = vadd.f32 %v129_v56, %v105_v52  ;;  %v134_v59 = vadd.f32 %v130_v57, %v106_v53  ;;  %v131_v60 = vadd.f32 %v127_v54, %v103_v50  ;;  %v132_v61 = vadd.f32 %v128_v55, %v104_v51  ;;  %v321_v56 = vld [vmem:[%s695_s5] sm:$0x7] }
  0xb9   :  { %v159_v63 = vadd.f32 %v142_v42, %v131_v60  ;;  %v160_v0 = vadd.f32 %v147_v43, %v132_v61  ;;  %v161_v1 = vadd.f32 %v152_v47, %v133_v58  ;;  %v162_v2 = vadd.f32 %v157_v62, %v134_v59  ;;  %v326_v57 = vpop.permute.xlu1 %325 }
  0xbb   :  { %v163_v3 = vmul.f32 0.5, %v159_v63  ;;  %v164_v4 = vmul.f32 0.5, %v160_v0  ;;  %v165_v5 = vmul.f32 0.5, %v161_v1  ;;  %v166_v6 = vmul.f32 0.5, %v162_v2 }
  0xbd   :  { %485 = vtanh.f32 %v163_v3 }
  0xbe   :  { %487 = vtanh.f32 %v164_v4 }
  0xbf   :  { %489 = vtanh.f32 %v165_v5 }
  0xc0   :  { %491 = vtanh.f32 %v166_v6 }
  0xc7   :  { %v486_v7 = vpop.eup %485 }
  0xc8   :  { %v488_v8 = vpop.eup %487  ;;  %v171_v9 = vmul.f32 0.5, %v486_v7 }
  0xc9   :  { %v490_v10 = vpop.eup %489  ;;  %v172_v11 = vmul.f32 0.5, %v488_v8 }
  0xca   :  { %v492_v12 = vpop.eup %491  ;;  %v175_v13 = vadd.f32 0.5, %v171_v9  ;;  %v173_v14 = vmul.f32 0.5, %v490_v10 }
  0xcb   :  { %v176_v15 = vadd.f32 0.5, %v172_v11  ;;  %v174_v16 = vmul.f32 0.5, %v492_v12 }
  0xcc   :  { %v177_v17 = vadd.f32 0.5, %v173_v14 }
  0xcd   :  { %v459_v18 = vpack.c.bf16 %v176_v15, %v175_v13  ;;  %v178_v19 = vadd.f32 0.5, %v174_v16 }
  0xcf   :  { %460 = vmatprep.subr.bf16.mxu0 %v459_v18  ;;  %v463_v20 = vpack.c.bf16 %v178_v19, %v177_v17 }
  0xd0   :  { %462 = vmatpush3.bf16.msra.mxu0 %v459_v18 }
  0xd1   :  { %464 = vmatprep.subr.bf16.mxu0 %v463_v20 }
  0xd4   :  { %466 = vmatpush3.bf16.msra.mxu0 %v463_v20 }
  0xd7   :  { %443 = vmatmul.mubr.msk.f32.vlgmr.msra.gmra.mrb[0].mxu0 %vm207_vm0, %v180_v21 }
  0xd8   :  { %445 = vmatprep.mubr.msk.f32.mxu0 %vm207_vm0, %v181_v22 }
  0xdb   :  { %446 = vmatmul.mubr.msk.f32.gmra.mrb[2].mxu0 %vm207_vm0, %v182_v23 }
 0x1aa   :  { %v444_v29 = vpop.f32.mrb[0].mxu0 }
 0x1ab   :  { %v292_v30 = vadd.f32 %v444_v29, %v195_v27  ;;  %v286_v31 = vpop.f32.mrb[1].mxu0 }
 0x1ac   :  { %v287_v32 = vadd.f32 %v286_v31, %v190_v26 }
 0x1ad   :  { %v306_v33 = vmul.f32 0.5, %v292_v30 }
 0x1ae   :  { %v305_v35 = vmul.f32 0.5, %v287_v32  ;;  %v447_v36 = vpop.f32.mrb[2].mxu0 }
 0x1af   :  { %493 = vtanh.f32 %v306_v33  ;;  %v302_v37 = vadd.f32 %v447_v36, %v205_v34  ;;  %v296_v38 = vpop.f32.mrb[3].mxu0 }
 0x1b0   :  { %495 = vtanh.f32 %v305_v35  ;;  %v297_v39 = vadd.f32 %v296_v38, %v200_v28 }
 0x1b1   :  { %v308_v40 = vmul.f32 0.5, %v302_v37 }
 0x1b2   :  { %v307_v41 = vmul.f32 0.5, %v297_v39 }
 0x1b3   :  { %497 = vtanh.f32 %v308_v40 }
 0x1b4   :  { %499 = vtanh.f32 %v307_v41 }
 0x1b9   :  { %v494_v42 = vpop.eup %493 }
 0x1ba   :  { %v496_v43 = vpop.eup %495  ;;  %v314_v44 = vmul.f32 0.5, %v494_v42 }
 0x1bb   :  { %v313_v45 = vmul.f32 0.5, %v496_v43 }
 0x1bc   :  { %v318_v46 = vadd.f32 0.5, %v314_v44 }
 0x1bd   :  { %v498_v47 = vpop.eup %497  ;;  %v317_v48 = vadd.f32 0.5, %v313_v45 }
 0x1be   :  { %v500_v49 = vpop.eup %499  ;;  %v316_v50 = vmul.f32 0.5, %v498_v47 }
 0x1bf   :  { %v315_v51 = vmul.f32 0.5, %v500_v49  ;;  %v468_v52 = vpack.c.bf16 %v318_v46, %v317_v48 }
 0x1c0   :  { %v320_v53 = vadd.f32 0.5, %v316_v50 }
 0x1c1   :  { %v319_v54 = vadd.f32 0.5, %v315_v51  ;;  %469 = vmatpush3.bf16.msra.mxu1 %v468_v52 }
 0x1c2   :  { %470 = vmatprep.subr.bf16.mxu1 %v527_v24 }
 0x1c3   :  { %v471_v55 = vpack.c.bf16 %v320_v53, %v319_v54 }
 0x1c5   :  { %472 = vmatpush3.bf16.msra.mxu1 %v471_v55 }
 0x1c8   :  { %457 = vmatmul.mubr.msk.f32.vlgmr.msra.gmra.mrb[0].mxu1 %vm207_vm0, %v321_v56 }
 0x29b   :  { %v397_v58 = vpop.f32.mrb[0].mxu1 }
 0x29c   :  { %v398_v59 = vadd.f32 %v397_v58, %v326_v57  ;;  %v458_v60 = vpop.f32.mrb[1].mxu1 }
 0x29e   :  { %401 = vst [vmem:[#allocation2] sm:$0x7] %v398_v59 }
 0x29f   :  { %512 = shalt.err (!%p509_p4)
}
 0x2a0   :  { %s513_s5 = scalar_lea.hbm %s697_s7, 64 }
 0x2a1   :  { %p514_p5 = scmp.ne.s32.totalorder %s697_s7, %s513_s5  ;;  %p517_p6 = scmp.lt.u32.totalorder %s513_s5, %s697_s7 }
 0x2a3   :  { %p519_p7 = pnand %p517_p6, %p514_p5 }
 0x2a5   :  { %522 = shalt.err (!%p519_p7)
}
 0x2a6   :  { %411 = dma.vmem_to_hbm [thread:$0]  %s409_s1, 64, %s697_s7, [#allocation3]  }
 0x2a7   :  { %523 = dma.done.wait [#allocation3], 64  }
 0x2a8   :  { %524 = vsyncadd [#allocation3], 4294967232 }
 0x2a9   :  { %415 = vsyncpa [#allocation3], 1 }

</bundles_post_ra>
